<compile_context>
chip_gen: v5e
topology: v5e:2x2
jax: 0.10.0
libtpu: 0.0.40
codegen_flags: <defaults>
</compile_context>

<pallas_src>
import functools
import math

import jax
import jax.numpy as jnp
from jax import lax
from jax.experimental import pallas as pl
from jax.experimental.pallas import tpu as pltpu


def _sdpa_kernel(q_ref, k_ref, v_ref, mask_ref, out_ref, attn_ref, *,
                 scale, G, d_k, TQ, mask_per_head, mask_resident,
                 scale_in_q, approx_recip):
    # One group of G heads per grid step; per-head 2-D matmuls (MXU-friendly).
    if mask_resident:
        # Mask is VMEM-resident over the whole (padded) S_q; slice the current tile.
        q0 = pl.multiple_of(pl.program_id(1) * TQ, TQ)
        mask_common = mask_ref[0, pl.ds(q0, TQ), :]
    elif not mask_per_head:
        mask_common = mask_ref[0]
    else:
        mask_common = None

    outs = []
    for g in range(G):
        if scale_in_q:
            # Fold 1/sqrt(d_k) into the (TQ, d_k) q tile (f32 inputs: exact enough,
            # S_k/d_k fewer VPU multiplies than scaling the scores plane).
            q = q_ref[g] * jnp.asarray(scale, q_ref.dtype)
            scores = lax.dot_general(
                q, k_ref[g],
                dimension_numbers=(((1,), (1,)), ((), ())),
                preferred_element_type=jnp.float32,
            )
        else:
            scores = lax.dot_general(
                q_ref[g], k_ref[g],
                dimension_numbers=(((1,), (1,)), ((), ())),
                preferred_element_type=jnp.float32,
            ) * scale

        m = mask_ref[g] if mask_per_head else mask_common
        # masked_fill_(attn_mask, -1e9): hard overwrite (not additive).
        scores = jnp.where(m != 0, jnp.float32(-1e9), scores)

        # Numerically stable softmax along the last axis.
        mx = jnp.max(scores, axis=-1, keepdims=True)
        e = jnp.exp(scores - mx)
        denom = jnp.sum(e, axis=-1, keepdims=True)
        inv = pl.reciprocal(denom, approx=approx_recip)

        # Single cast of the (TQ, S_k) weights plane: reused for the write-back
        # AND as the P @ V matmul operand.
        w = (e * inv).astype(attn_ref.dtype)
        attn_ref[g] = w
        outs.append(jnp.dot(w, v_ref[g], preferred_element_type=jnp.float32))

    # Lane-dense output slab: heads concatenated along the last dim (width G*d_k).
    o = outs[0] if G == 1 else jnp.concatenate(outs, axis=-1)
    out_ref[0] = o.astype(out_ref.dtype)


def _vmem_budget_and_limit():
    """Generation-aware (tile budget, scoped vmem limit) in bytes."""
    cap = None
    try:
        info = pltpu.get_tpu_info()
        cap = getattr(info, "vmem_capacity_bytes", None)
    except Exception:
        cap = None
    if cap is None:
        cap = 64 << 20          # conservative fallback (safe on every generation)
    if cap >= (128 << 20):      # v5e / v6e: 128 MiB physical VMEM
        return 64 << 20, 96 << 20
    # ~64 MiB parts (v7x): leave headroom for compiler-internal scratch.
    return min(24 << 20, (cap * 3) // 8), min(40 << 20, (cap * 5) // 8)


def _choose_tq(S_q, S_k, d_k, G, io_it, attn_it, mask_term, budget_bytes,
               max_tq=512):
    """Pick the query-tile size TQ and the (possibly padded) S_q it implies."""

    def est(tq):
        return (2 * G * tq * d_k * io_it          # q blocks (double-buffered)
                + 2 * tq * G * d_k * io_it        # output blocks (double-buffered)
                + 4 * G * S_k * d_k * io_it       # k + v blocks (double-buffered)
                + mask_term(tq)                   # mask block bytes
                + 2 * G * tq * S_k * attn_it      # attn-weights out blocks
                + 2 * tq * S_k * 4                # f32 scores / exp temps
                + tq * S_k * attn_it)             # reused low-precision weights plane

    # Small sequences: one tile covering all of S_q (block dim == full dim is legal).
    if S_q <= max_tq and est(S_q) <= budget_bytes:
        return S_q, S_q

    # Largest multiple of 32 (<= max_tq) that fits the budget.
    best = 32
    for t in range(32, max_tq + 1, 32):
        if est(t) <= budget_bytes:
            best = t

    # Prefer a divisor of S_q near `best` so no padding is needed.
    divs = [t for t in range(32, best + 1, 32) if S_q % t == 0]
    if divs and 2 * divs[-1] >= best:
        return divs[-1], S_q

    # Otherwise pad S_q up to a multiple of `best` (outputs sliced back in wrapper).
    s_q_pad = ((S_q + best - 1) // best) * best
    return best, s_q_pad


def scaled_dot_product_attention(q, k, v, attn_mask, attn_weights_dtype=None):
    """q, k, v: [B, H, S, d_k]; attn_mask: [B|1, H|1, S_q, S_k] (bool/int, nonzero =
    masked, matching torch masked_fill_ semantics).

    Returns (output [B, H, S_q, d_k], attn_weights [B, H, S_q, S_k]).
    attn_weights_dtype: optional opt-in lower-precision weights output (e.g.
    jnp.bfloat16 for f32 inputs) to halve the dominant HBM write-back; defaults
    to the input dtype (PyTorch-faithful)."""
    B, H, S_q, d_k = q.shape
    S_k = k.shape[2]
    BH = B * H

    io_dtype = jnp.dtype(q.dtype)
    attn_dtype = jnp.dtype(attn_weights_dtype) if attn_weights_dtype is not None \
        else io_dtype
    io_it = io_dtype.itemsize
    attn_it = attn_dtype.itemsize

    # Head packing: G heads per grid step so the output slab last dim is G*d_k.
    G = 1
    if d_k < 128:
        G = max(1, min(8, 128 // d_k))
        G = math.gcd(G, H)          # keep groups within a batch / aligned with head broadcasts

    mB, mH = attn_mask.shape[0], attn_mask.shape[1]
    budget, vmem_limit = _vmem_budget_and_limit()

    # Fully-broadcast small masks become VMEM-resident (single DMA for the kernel).
    mask_resident = (mB == 1 and mH == 1) and (2 * (S_q + 512) * S_k) <= (2 << 20)
    if mask_resident:
        mask_term = lambda tq: 2 * (S_q + 512) * S_k
    else:
        mask_heads = G if ((mB == B and mH == H) or (mB == 1 and mH == H)) else 1
        mask_term = lambda tq: 2 * mask_heads * tq * S_k

    TQ, S_q_pad = _choose_tq(S_q, S_k, d_k, G, io_it, attn_it, mask_term, budget)
    n_q_tiles = S_q_pad // TQ

    qf = q.reshape(BH, S_q, d_k)
    kf = k.reshape(BH, S_k, d_k)
    vf = v.reshape(BH, S_k, d_k)
    # Mask travels 1 byte wide end-to-end; broadcast dims are handled by index maps.
    maskf = attn_mask.astype(jnp.int8).reshape(mB * mH, S_q, S_k)

    if S_q_pad != S_q:
        pad = S_q_pad - S_q
        qf = jnp.pad(qf, ((0, 0), (0, pad), (0, 0)))
        maskf = jnp.pad(maskf, ((0, 0), (0, pad), (0, 0)))   # padded rows unmasked

    # Mask BlockSpec per broadcast pattern (no HBM replication).
    if mask_resident:
        mask_spec = pl.BlockSpec((1, S_q_pad, S_k), lambda g, qi: (0, 0, 0))
        mask_per_head = False
    elif mB == B and mH == H:
        mask_spec = pl.BlockSpec((G, TQ, S_k), lambda g, qi: (g, qi, 0))
        mask_per_head = True
    elif mB == B and mH == 1:
        hpg = H // G
        mask_spec = pl.BlockSpec((1, TQ, S_k), lambda g, qi: (g // hpg, qi, 0))
        mask_per_head = False
    elif mB == 1 and mH == H:
        hpg = H // G
        mask_spec = pl.BlockSpec((G, TQ, S_k), lambda g, qi: (g % hpg, qi, 0))
        mask_per_head = True
    else:  # (1, 1) but too large to keep resident
        mask_spec = pl.BlockSpec((1, TQ, S_k), lambda g, qi: (0, qi, 0))
        mask_per_head = False

    kernel = functools.partial(
        _sdpa_kernel,
        scale=1.0 / math.sqrt(d_k),
        G=G, d_k=d_k, TQ=TQ,
        mask_per_head=mask_per_head,
        mask_resident=mask_resident,
        scale_in_q=(io_dtype == jnp.dtype(jnp.float32)),
        approx_recip=(attn_dtype != jnp.dtype(jnp.float32)),
    )

    # Grid: (head groups, q tiles).  Head groups lead so k/v stay VMEM-resident
    # across the inner qi loop (and each v7x core keeps its own k/v).
    out, attn = pl.pallas_call(
        kernel,
        out_shape=(
            jax.ShapeDtypeStruct((BH // G, S_q_pad, G * d_k), io_dtype),
            jax.ShapeDtypeStruct((BH, S_q_pad, S_k), attn_dtype),
        ),
        grid_spec=pltpu.PrefetchScalarGridSpec(
            num_scalar_prefetch=0,
            grid=(BH // G, n_q_tiles),
            in_specs=[
                pl.BlockSpec((G, TQ, d_k), lambda g, qi: (g, qi, 0)),    # q tiles
                pl.BlockSpec((G, S_k, d_k), lambda g, qi: (g, 0, 0)),    # k (resident per group)
                pl.BlockSpec((G, S_k, d_k), lambda g, qi: (g, 0, 0)),    # v (resident per group)
                mask_spec,                                               # int8 mask
            ],
            out_specs=[
                pl.BlockSpec((1, TQ, G * d_k), lambda g, qi: (g, qi, 0)),  # packed output
                pl.BlockSpec((G, TQ, S_k), lambda g, qi: (g, qi, 0)),      # attn weights
            ],
        ),
        compiler_params=pltpu.CompilerParams(
            dimension_semantics=("parallel", "parallel"),
            vmem_limit_bytes=vmem_limit,
        ),
    )(qf, kf, vf, maskf)

    # Un-pack heads from the lane-dense output slab and drop any S_q padding.
    out = out.reshape(BH // G, S_q_pad, G, d_k).transpose(0, 2, 1, 3)
    out = out.reshape(B, H, S_q_pad, d_k)[:, :, :S_q, :]
    attn = attn.reshape(B, H, S_q_pad, S_k)[:, :, :S_q, :]
    return out, attn


def _reference(q, k, v, attn_mask):
    d_k = q.shape[-1]
    scores = jnp.einsum("bhqd,bhkd->bhqk", q, k) / math.sqrt(d_k)
    scores = jnp.where(attn_mask, -1e9, scores)
    w = jax.nn.softmax(scores, axis=-1)
    out = jnp.einsum("bhqk,bhkd->bhqd", w, v)
    return out, w


if __name__ == "__main__":
    key = jax.random.PRNGKey(0)
    B, H, S, D = 2, 2, 8, 32  # batch, heads, seq, d_k

    kq, kk, kv, km = jax.random.split(key, 4)
    q = jax.random.normal(kq, (B, H, S, D), dtype=jnp.float32)
    k = jax.random.normal(kk, (B, H, S, D), dtype=jnp.float32)
    v = jax.random.normal(kv, (B, H, S, D), dtype=jnp.float32)
    # Random boolean mask (True = masked out), keep at least one unmasked per row.
    attn_mask = jax.random.bernoulli(km, p=0.25, shape=(B, H, S, S))
    attn_mask = attn_mask.at[..., 0].set(False)

    out, attn = scaled_dot_product_attention(q, k, v, attn_mask)
    out = jax.block_until_ready(out)
    attn = jax.block_until_ready(attn)

    ref_out, ref_attn = _reference(q, k, v, attn_mask)
    assert jnp.allclose(out, ref_out, atol=5e-3, rtol=5e-3), "output mismatch"
    assert jnp.allclose(attn, ref_attn, atol=5e-3, rtol=5e-3), "attn mismatch"

    print("KERNEL_OK")
</pallas_src>

<mosaic_0001>
module attributes {stable_mosaic.version = 11 : i64} {
  func.func @_sdpa_kernel(%arg0: i32, %arg1: i32, %arg2: memref<2x8x32xf32, #tpu.memory_space<vmem>>, %arg3: memref<2x8x32xf32, #tpu.memory_space<vmem>>, %arg4: memref<2x8x32xf32, #tpu.memory_space<vmem>>, %arg5: memref<2x8x8xi8, #tpu.memory_space<vmem>>, %arg6: memref<1x8x64xf32, #tpu.memory_space<vmem>>, %arg7: memref<2x8x8xf32, #tpu.memory_space<vmem>>) attributes {dimension_semantics = [#tpu.dimension_semantics<parallel>, #tpu.dimension_semantics<parallel>], iteration_bounds = array<i64: 2, 1>, scalar_prefetch = 0 : i64, scratch_operands = 0 : i64, tpu.core_type = #tpu.core_type<tc>, window_params = [{transform_indices = @transform_0, window_bounds = array<i64: 2, 8, 32>}, {transform_indices = @transform_1, window_bounds = array<i64: 2, 8, 32>}, {transform_indices = @transform_2, window_bounds = array<i64: 2, 8, 32>}, {transform_indices = @transform_3, window_bounds = array<i64: 2, 8, 8>}, {transform_indices = @transform_4, window_bounds = array<i64: 1, 8, 64>}, {transform_indices = @transform_5, window_bounds = array<i64: 2, 8, 8>}]} {
    %c0 = arith.constant 0 : index
    %c0_0 = arith.constant 0 : index
    %c0_1 = arith.constant 0 : index
    %0 = vector.load %arg2[%c0, %c0_0, %c0_1] : memref<2x8x32xf32, #tpu.memory_space<vmem>>, vector<1x8x32xf32>
    %1 = vector.shape_cast %0 : vector<1x8x32xf32> to vector<8x32xf32>
    %cst = arith.constant 0.176776692 : f32
    %2 = vector.broadcast %cst : f32 to vector<8x32xf32>
    %3 = arith.mulf %1, %2 : vector<8x32xf32>
    %c0_2 = arith.constant 0 : index
    %c0_3 = arith.constant 0 : index
    %c0_4 = arith.constant 0 : index
    %4 = vector.load %arg3[%c0_2, %c0_3, %c0_4] : memref<2x8x32xf32, #tpu.memory_space<vmem>>, vector<1x8x32xf32>
    %5 = vector.shape_cast %4 : vector<1x8x32xf32> to vector<8x32xf32>
    %cst_5 = arith.constant dense<0.000000e+00> : vector<8x8xf32>
    %6 = tpu.matmul %3, %5, %cst_5 {dimension_numbers = #tpu.dot_dimension_numbers<[1], [1], [0], [0], [0, 0, 1, 0], [], []>} : vector<8x32xf32>, vector<8x32xf32>, vector<8x8xf32> -> vector<8x8xf32>
    %c0_6 = arith.constant 0 : index
    %c0_7 = arith.constant 0 : index
    %c0_8 = arith.constant 0 : index
    %7 = vector.load %arg5[%c0_6, %c0_7, %c0_8] : memref<2x8x8xi8, #tpu.memory_space<vmem>>, vector<1x8x8xi8>
    %8 = vector.shape_cast %7 : vector<1x8x8xi8> to vector<8x8xi8>
    %c0_i8 = arith.constant 0 : i8
    %9 = vector.broadcast %c0_i8 : i8 to vector<8x8xi8>
    %10 = arith.cmpi ne, %8, %9 : vector<8x8xi8>
    %cst_9 = arith.constant -1.000000e+09 : f32
    %11 = vector.broadcast %cst_9 : f32 to vector<8x8xf32>
    %12 = arith.select %10, %11, %6 : vector<8x8xi1>, vector<8x8xf32>
    %cst_10 = arith.constant dense<0xFF800000> : vector<8xf32>
    %13 = vector.multi_reduction <maximumf>, %12, %cst_10 [1] : vector<8x8xf32> to vector<8xf32>
    %14 = vector.shape_cast %13 : vector<8xf32> to vector<8x1xf32>
    %15 = vector.broadcast %14 : vector<8x1xf32> to vector<8x8xf32>
    %16 = arith.subf %12, %15 : vector<8x8xf32>
    %17 = math.exp %16 : vector<8x8xf32>
    %cst_11 = arith.constant dense<0.000000e+00> : vector<8xf32>
    %18 = vector.multi_reduction <add>, %17, %cst_11 [1] : vector<8x8xf32> to vector<8xf32>
    %19 = vector.shape_cast %18 : vector<8xf32> to vector<8x1xf32>
    %20 = tpu.reciprocal %19 : vector<8x1xf32> -> vector<8x1xf32>
    %21 = vector.broadcast %20 : vector<8x1xf32> to vector<8x8xf32>
    %22 = arith.mulf %17, %21 : vector<8x8xf32>
    %c0_12 = arith.constant 0 : index
    %c0_13 = arith.constant 0 : index
    %c0_14 = arith.constant 0 : index
    %23 = vector.load %arg7[%c0_12, %c0_13, %c0_14] : memref<2x8x8xf32, #tpu.memory_space<vmem>>, vector<1x8x8xf32>
    %24 = vector.shape_cast %23 : vector<1x8x8xf32> to vector<8x8xf32>
    %25 = vector.shape_cast %22 : vector<8x8xf32> to vector<1x8x8xf32>
    tpu.vector_store %arg7[%c0_12, %c0_13, %c0_14], %25 {strides = array<i32>} : memref<2x8x8xf32, #tpu.memory_space<vmem>>, vector<1x8x8xf32>,
    %c0_15 = arith.constant 0 : index
    %c0_16 = arith.constant 0 : index
    %c0_17 = arith.constant 0 : index
    %26 = vector.load %arg4[%c0_15, %c0_16, %c0_17] : memref<2x8x32xf32, #tpu.memory_space<vmem>>, vector<1x8x32xf32>
    %27 = vector.shape_cast %26 : vector<1x8x32xf32> to vector<8x32xf32>
    %cst_18 = arith.constant dense<0.000000e+00> : vector<8x32xf32>
    %28 = tpu.matmul %22, %27, %cst_18 {dimension_numbers = #tpu.dot_dimension_numbers<[1], [0], [0], [1], [0, 0, 1, 1], [], []>} : vector<8x8xf32>, vector<8x32xf32>, vector<8x32xf32> -> vector<8x32xf32>
    %c1 = arith.constant 1 : index
    %c0_19 = arith.constant 0 : index
    %c0_20 = arith.constant 0 : index
    %29 = vector.load %arg2[%c1, %c0_19, %c0_20] : memref<2x8x32xf32, #tpu.memory_space<vmem>>, vector<1x8x32xf32>
    %30 = vector.shape_cast %29 : vector<1x8x32xf32> to vector<8x32xf32>
    %cst_21 = arith.constant 0.176776692 : f32
    %31 = vector.broadcast %cst_21 : f32 to vector<8x32xf32>
    %32 = arith.mulf %30, %31 : vector<8x32xf32>
    %c1_22 = arith.constant 1 : index
    %c0_23 = arith.constant 0 : index
    %c0_24 = arith.constant 0 : index
    %33 = vector.load %arg3[%c1_22, %c0_23, %c0_24] : memref<2x8x32xf32, #tpu.memory_space<vmem>>, vector<1x8x32xf32>
    %34 = vector.shape_cast %33 : vector<1x8x32xf32> to vector<8x32xf32>
    %cst_25 = arith.constant dense<0.000000e+00> : vector<8x8xf32>
    %35 = tpu.matmul %32, %34, %cst_25 {dimension_numbers = #tpu.dot_dimension_numbers<[1], [1], [0], [0], [0, 0, 1, 0], [], []>} : vector<8x32xf32>, vector<8x32xf32>, vector<8x8xf32> -> vector<8x8xf32>
    %c1_26 = arith.constant 1 : index
    %c0_27 = arith.constant 0 : index
    %c0_28 = arith.constant 0 : index
    %36 = vector.load %arg5[%c1_26, %c0_27, %c0_28] : memref<2x8x8xi8, #tpu.memory_space<vmem>>, vector<1x8x8xi8>
    %37 = vector.shape_cast %36 : vector<1x8x8xi8> to vector<8x8xi8>
    %c0_i8_29 = arith.constant 0 : i8
    %38 = vector.broadcast %c0_i8_29 : i8 to vector<8x8xi8>
    %39 = arith.cmpi ne, %37, %38 : vector<8x8xi8>
    %cst_30 = arith.constant -1.000000e+09 : f32
    %40 = vector.broadcast %cst_30 : f32 to vector<8x8xf32>
    %41 = arith.select %39, %40, %35 : vector<8x8xi1>, vector<8x8xf32>
    %cst_31 = arith.constant dense<0xFF800000> : vector<8xf32>
    %42 = vector.multi_reduction <maximumf>, %41, %cst_31 [1] : vector<8x8xf32> to vector<8xf32>
    %43 = vector.shape_cast %42 : vector<8xf32> to vector<8x1xf32>
    %44 = vector.broadcast %43 : vector<8x1xf32> to vector<8x8xf32>
    %45 = arith.subf %41, %44 : vector<8x8xf32>
    %46 = math.exp %45 : vector<8x8xf32>
    %cst_32 = arith.constant dense<0.000000e+00> : vector<8xf32>
    %47 = vector.multi_reduction <add>, %46, %cst_32 [1] : vector<8x8xf32> to vector<8xf32>
    %48 = vector.shape_cast %47 : vector<8xf32> to vector<8x1xf32>
    %49 = tpu.reciprocal %48 : vector<8x1xf32> -> vector<8x1xf32>
    %50 = vector.broadcast %49 : vector<8x1xf32> to vector<8x8xf32>
    %51 = arith.mulf %46, %50 : vector<8x8xf32>
    %c1_33 = arith.constant 1 : index
    %c0_34 = arith.constant 0 : index
    %c0_35 = arith.constant 0 : index
    %52 = vector.load %arg7[%c1_33, %c0_34, %c0_35] : memref<2x8x8xf32, #tpu.memory_space<vmem>>, vector<1x8x8xf32>
    %53 = vector.shape_cast %52 : vector<1x8x8xf32> to vector<8x8xf32>
    %54 = vector.shape_cast %51 : vector<8x8xf32> to vector<1x8x8xf32>
    tpu.vector_store %arg7[%c1_33, %c0_34, %c0_35], %54 {strides = array<i32>} : memref<2x8x8xf32, #tpu.memory_space<vmem>>, vector<1x8x8xf32>,
    %c1_36 = arith.constant 1 : index
    %c0_37 = arith.constant 0 : index
    %c0_38 = arith.constant 0 : index
    %55 = vector.load %arg4[%c1_36, %c0_37, %c0_38] : memref<2x8x32xf32, #tpu.memory_space<vmem>>, vector<1x8x32xf32>
    %56 = vector.shape_cast %55 : vector<1x8x32xf32> to vector<8x32xf32>
    %cst_39 = arith.constant dense<0.000000e+00> : vector<8x32xf32>
    %57 = tpu.matmul %51, %56, %cst_39 {dimension_numbers = #tpu.dot_dimension_numbers<[1], [0], [0], [1], [0, 0, 1, 1], [], []>} : vector<8x8xf32>, vector<8x32xf32>, vector<8x32xf32> -> vector<8x32xf32>
    %58 = tpu.concatenate %28, %57 in 1 : vector<8x32xf32>, vector<8x32xf32> -> vector<8x64xf32>
    %c0_40 = arith.constant 0 : index
    %c0_41 = arith.constant 0 : index
    %c0_42 = arith.constant 0 : index
    %59 = vector.load %arg6[%c0_40, %c0_41, %c0_42] : memref<1x8x64xf32, #tpu.memory_space<vmem>>, vector<1x8x64xf32>
    %60 = vector.shape_cast %59 : vector<1x8x64xf32> to vector<8x64xf32>
    %61 = vector.shape_cast %58 : vector<8x64xf32> to vector<1x8x64xf32>
    tpu.vector_store %arg6[%c0_40, %c0_41, %c0_42], %61 {strides = array<i32>} : memref<1x8x64xf32, #tpu.memory_space<vmem>>, vector<1x8x64xf32>,
    return
  }
  func.func @transform_0(%arg0: i32, %arg1: i32) -> (i32, i32, i32) {
    %c0_i32 = arith.constant 0 : i32
    %c0_i32_0 = arith.constant 0 : i32
    return %arg0, %arg1, %c0_i32 : i32, i32, i32
  }
  func.func @transform_1(%arg0: i32, %arg1: i32) -> (i32, i32, i32) {
    %c0_i32 = arith.constant 0 : i32
    %c0_i32_0 = arith.constant 0 : i32
    %c0_i32_1 = arith.constant 0 : i32
    return %arg0, %c0_i32, %c0_i32_0 : i32, i32, i32
  }
  func.func @transform_2(%arg0: i32, %arg1: i32) -> (i32, i32, i32) {
    %c0_i32 = arith.constant 0 : i32
    %c0_i32_0 = arith.constant 0 : i32
    %c0_i32_1 = arith.constant 0 : i32
    return %arg0, %c0_i32, %c0_i32_0 : i32, i32, i32
  }
  func.func @transform_3(%arg0: i32, %arg1: i32) -> (i32, i32, i32) {
    %c0_i32 = arith.constant 0 : i32
    %c0_i32_0 = arith.constant 0 : i32
    return %arg0, %arg1, %c0_i32 : i32, i32, i32
  }
  func.func @transform_4(%arg0: i32, %arg1: i32) -> (i32, i32, i32) {
    %c0_i32 = arith.constant 0 : i32
    %c0_i32_0 = arith.constant 0 : i32
    return %arg0, %arg1, %c0_i32 : i32, i32, i32
  }
  func.func @transform_5(%arg0: i32, %arg1: i32) -> (i32, i32, i32) {
    %c0_i32 = arith.constant 0 : i32
    %c0_i32_0 = arith.constant 0 : i32
    return %arg0, %arg1, %c0_i32 : i32, i32, i32
  }
}

</mosaic_0001>

<bundles_post_ra>
// kernel: tpu_custom_call.1
= control target key start
LH: loop header
LB: loop body
LE: loop exit
PB: predicated region body
PF: predicated region fallthrough
CT: control target
= control target key end

     0   :  { %s1454_s0 = inlined_call_operand.hbm [shape: f32[4,8,32], index: 0, kind: input, shape index: {}]   ;;  %s1455_s1 = inlined_call_operand.hbm [shape: f32[4,8,32], index: 1, kind: input, shape index: {}]   ;;  %s1456_s2 = inlined_call_operand.hbm [shape: f32[4,8,32], index: 2, kind: input, shape index: {}]   ;;  %s1457_s3 = inlined_call_operand.hbm [shape: s8[4,8,8], index: 3, kind: input, shape index: {}]   ;;  %s1458_s4 = inlined_call_operand.hbm [shape: f32[2,8,64], index: 4, kind: output, shape index: {0}]   ;;  %s1459_s5 = inlined_call_operand.hbm [shape: f32[4,8,8], index: 5, kind: output, shape index: {1}]  }
   0x1   :  { %1467 = sst [smem:[#allocation24_spill]] %s1454_s0 }
   0x2   :  { %1468 = sst [smem:[#allocation25_spill]] %s1455_s1 }
   0x3   :  { %1469 = sst [smem:[#allocation26_spill]] %s1458_s4 }
   0x4   :  { %11 = vsyncpa [#allocation3], 0 }
   0x5   :  { %13 = vsyncpa [#allocation3 + $0x1], 0 }
   0x6   :  { %14 = vsyncpa [#allocation6], 0 }
   0x7   :  { %16 = vsyncpa [#allocation6 + $0x1], 0 }
   0x8   :  { %17 = vsyncpa [#allocation9], 0 }
   0x9   :  { %19 = vsyncpa [#allocation9 + $0x1], 0 }
   0xa   :  { %20 = vsyncpa [#allocation4], 0 }
   0xb   :  { %22 = vsyncpa [#allocation4 + $0x1], 0 }
   0xc   :  { %23 = vsyncpa [#allocation12], 0 }
   0xd   :  { %25 = vsyncpa [#allocation12 + $0x1], 0  ;;  %s1240_s18 = smov 0   ;;  %s1242_s19 = smov 0  }
   0xe   :  { %s1244_s20 = smov 0   ;;  %s1246_s21 = smov 0  }
   0xf   :  { %s1248_s22 = smov 0   ;;  %s1250_s23 = smov 0  }
  0x10 LB: > { %1470 = sst [smem:[#allocation18_spill]] %s1180_s18  ;;  %s1271_s24 = sadd.s32 4294967295, %s1200_s23   ;;  %s1200_s23 = sphi %s1250_s23, %s31_s23   ;;  %s1196_s22 = sphi %s1248_s22, %s1494_s22   ;;  %s1192_s21 = sphi %s1246_s21, %s1493_s21   ;;  %s1188_s20 = sphi %s1244_s20, %s1489_s20   ;;  %s1184_s19 = sphi %s1242_s19, %s1492_s19   ;;  %s1180_s18 = sphi %s1240_s18, %s1491_s18  }
  0x11   : > { %1471 = sst [smem:[#allocation19_spill]] %s1188_s20  ;;  %s815_s25 = sadd.s32 4294967294, %s1200_s23  }
  0x12   : > { %1472 = sst [smem:[#allocation20_spill]] %s1200_s23  ;;  %s43_s26 = sadd.s32 1, %s1196_s22 }
  0x13   : > { %s52_s27 = sadd.s32 1, %s1188_s20  ;;  %p45_p0 = scmp.ge.s32.totalorder %s43_s26, 2 }
  0x14   : > { %p59_p1 = scmp.ne.s32.totalorder %s1188_s20, %s1184_s19  ;;  %p60_p2 = scmp.eq.s32.totalorder %s1200_s23, 0 }
  0x15   : > { %p65_p3 = scmp.ne.s32.totalorder %s1184_s19, %s1180_s18  ;;  %s1496_s26 = smov (%p45_p0, %s43_s26), 0 }
  0x16   : > { %1473 = sst [smem:[#allocation21_spill]] %s1496_s26  ;;  %p1283_p4 = por %p60_p2, %p59_p1 }
  0x17   : > { %p66_p5 = scmp.eq.s32.totalorder %s1271_s24, 0  ;;  %s47_s29 = ssub.s32 %s1196_s22, %s1496_s26 }
  0x18   : > { %p171_p6 = scmp.eq.s32.totalorder %s1271_s24, 1  ;;  %p50_p7 = scmp.eq.s32.totalorder %s47_s29, 0 }
  0x19   : > { %p1291_p8 = por %p66_p5, %p65_p3  ;;  %p177_p10 = scmp.eq.s32.totalorder %s815_s25, 1 }
  0x1a   : > { %p1295_p9 = por %p171_p6, %p59_p1  ;;  %p817_p12 = scmp.ge.s32.totalorder %s1200_s23, 2 }
  0x1b   : > { %s1300_s7 = scalar_select %p50_p7, %s1188_s20, %s52_s27  }
  0x1c   : > { %p1302_p11 = por %p177_p10, %p65_p3  ;;  %p892_p13 = scmp.lt.s32.totalorder %s1200_s23, 2 }
  0x1d   : > { %1477 = sst [smem:[#allocation22_spill]] %s1300_s7  ;;  %s1309_s9 = sand.u32 1, %s1188_s20  }
  0x1e   : > { %s1478_s8 = scalar_select %p1302_p11, 1, 0 }
  0x1f   : > { %s1312_s10 = sshll.u32 %s1309_s9, 4  ;;  %s855_s11 = sshll.u32 %s1196_s22, 4 }
  0x20   : > { %1479 = sst [smem:[#allocation23_spill]] %s1478_s8  ;;  %p1317_p0 = pnand %p892_p13, %p1283_p4 }
  0x21   : > { %s248_s13 = sand.u32 1, %s1200_s23   ;;  %s1481_s1 = sld [smem:[#allocation25_spill]] }
  0x22   : > { %s252_s25 = scalar_lea.vmem [#allocation5], %s1312_s10  ;;  %s249_s29 = scalar_lea.sflag [#allocation6], %s248_s13 }
  0x23   : > { %s260_s27 = sshll.u32 %s252_s25, 4  ;;  %s1202_s28 = smov 128   ;;  %s261_s27 = int_to_ptr.vmem [resolvable:$true] %s260_s27 }
  0x24   : > { %s1203_s26 = smov 8   ;;  %p830_p1 = scmp.ge.s32.totalorder %s1200_s23, 1 }
  0x25   : > { %p313_p2 = scmp.lt.s32.totalorder %s1200_s23, 3  ;;  %s1483_s0 = sld [smem:[#allocation24_spill]] }
  0x26   : > { %s229_s13 = scalar_lea.vmem [#allocation2], %s1312_s10  ;;  %s226_s20 = scalar_lea.sflag [#allocation3], %s1309_s9 }
  0x27   : > { %s257_s16 = scalar_lea.hbm %s1481_s1, %s855_s11  ;;  %p1330_p3 = pnand %p830_p1, %p313_p2 }
  0x28   : > { %s258_s17 = sshll.u32 %s257_s16, 4  ;;  %s238_s7 = sshll.u32 %s229_s13, 4  ;;  %s259_s17 = int_to_ptr.hbm [resolvable:$true] %s258_s17  ;;  %s239_s7 = int_to_ptr.vmem [resolvable:$true] %s238_s7 }
  0x29   : > { %878 = dma.hbm_to_vmem [thread:$0]  (!%p1317_p0), %s259_s17, 256, %s261_s27, %s249_s29, %s1202_s28, %s1202_s28, %s1203_s26  }
  0x2a   : > { %s279_s23 = scalar_lea.hbm %s1456_s2, %s855_s11  ;;  %s274_s18 = scalar_lea.vmem [#allocation7], %s1312_s10 }
  0x2b   : > { %s235_s25 = scalar_lea.hbm %s1483_s0, %s855_s11  ;;  %s280_s8 = sshll.u32 %s279_s23, 4  ;;  %s281_s8 = int_to_ptr.hbm [resolvable:$true] %s280_s8 }
  0x2c   : > { %s236_s1 = sshll.u32 %s235_s25, 4  ;;  %s282_s15 = sshll.u32 %s274_s18, 4  ;;  %s237_s1 = int_to_ptr.hbm [resolvable:$true] %s236_s1  ;;  %s283_s15 = int_to_ptr.vmem [resolvable:$true] %s282_s15 }
  0x2d   : > { %875 = dma.hbm_to_vmem [thread:$0]  (!%p1317_p0), %s237_s1, 256, %s239_s7, %s226_s20, %s1202_s28, %s1202_s28, %s1203_s26  }
  0x2e   : > { %881 = dma.hbm_to_vmem [thread:$0]  (!%p1317_p0), %s281_s8, 256, %s283_s15, %s249_s29, %s1202_s28, %s1202_s28, %s1203_s26  }
  0x2f   : > { %s827_s16 = sshll.u32 %s1309_s9, 2  ;;  %s858_s25 = sshll.u32 %s1196_s22, 2 }
  0x30   : > { %s302_s4 = scalar_lea.hbm %s1457_s3, %s858_s25  ;;  %s296_s1 = scalar_lea.vmem [#allocation8], %s827_s16 }
  0x31   : > { %s305_s20 = sshll.u32 %s296_s1, 4  ;;  %s303_s7 = sshll.u32 %s302_s4, 4  ;;  %s306_s20 = int_to_ptr.vmem [resolvable:$true] %s305_s20  ;;  %s304_s7 = int_to_ptr.hbm [resolvable:$true] %s303_s7 }
  0x32   : > { %s293_s11 = scalar_lea.sflag [#allocation9], %s1309_s9  ;;  %s1204_s23 = smov 32  }
  0x33   : > { %s1205_s10 = smov 2   ;;  %317 = sbr.rel (%p1330_p3) target bundleno = 691 (0x2b3), region = 36 }
  0x34   : > { %884 = dma.hbm_to_vmem [thread:$0]  (!%p1317_p0), %s304_s7, 64, %s306_s20, %s293_s11, %s1204_s23, %s1204_s23, %s1205_s10  }
  0x35   : > { %s1358_s18 = sand.u32 (!%p1330_p3), 1, %s1184_s19  }
  0x36   : > { %s1361_s0 = sshll.u32 (!%p1330_p3), %s1358_s18, 4  ;;  %s320_s4 = scalar_lea.sflag (!%p1330_p3), [#allocation3], %s1358_s18 }
  0x37   : > { %s323_s26 = scalar_lea.vmem (!%p1330_p3), [#allocation2], %s1361_s0 }
  0x38   : > { %1159 = dma.done.wait (%p1291_p8), %s320_s4, 256  }
  0x39   : > { %1161 = vsyncadd (%p1291_p8), %s320_s4, 4294967040  ;;  %s329_s8 = sand.u32 1, %s1271_s24   ;;  %s333_s12 = scalar_lea.vmem [#allocation5], %s1361_s0 }
  0x3a   : > { %s330_s9 = scalar_lea.sflag [#allocation6], %s329_s8 }
  0x3b   : > { %1163 = dma.done.wait (%p1291_p8), %s330_s9, 512  }
  0x3c   : > { %1165 = vsyncadd (%p1291_p8), %s330_s9, 4294966784  ;;  %s834_s29 = sshll.u32 %s1358_s18, 2  ;;  %s343_s28 = scalar_lea.vmem [#allocation7], %s1361_s0 }
  0x3d   : > { %s350_s14 = scalar_lea.sflag [#allocation9], %s1358_s18  ;;  %s353_s17 = scalar_lea.vmem [#allocation8], %s834_s29 }
  0x3e   : > { %1167 = dma.done.wait (%p1291_p8), %s350_s14, 64  }
  0x3f   : > { %1169 = vsyncadd (%p1291_p8), %s350_s14, 4294967232  ;;  %vm411_vm0 = vcmask 261120   ;;  %v841_v0 = vld [vmem:[%s333_s12 + $0x8] sm:$0xff]  ;;  %v410_v2 = vld [vmem:[%s333_s12] sm:$0xff]  ;;  %v1206_v8 = vmov 0   ;;  %vm444_vm4 = vcmask 64512  }
  0x40   : > { %v840_v1 = vld [vmem:[%s323_s26 + $0x8] sm:$0xff]  ;;  %842 = vmatpush.xpose.msk.msra.mxu2 %vm411_vm0, %v841_v0  ;;  %837 = vmatpush.xpose.msk.msra.mxu0 %vm411_vm0, %v410_v2  ;;  %v408_v4 = vld [vmem:[%s323_s26] sm:$0xff]  ;;  %s400_s24 = scalar_lea.vmem [#allocation11], %s1361_s0  ;;  %s859_s30 = sshll.u32 %s1192_s21, 4 }
  0x41   : > { %v496_v3 = vmul.f32 0.17677669, %v840_v1  ;;  %v409_v5 = vmul.f32 0.17677669, %v408_v4  ;;  %v844_v6 = vld [vmem:[%s353_s17 + $0x2] sm:$0x3]  ;;  %s623_s25 = scalar_lea.hbm %s1459_s5, %s859_s30 }
  0x42   : > { %vm527_vm1 = vnez %v844_v6  ;;  %v438_v7 = vld [vmem:[%s353_s17] sm:$0x3]  ;;  %v846_v29 = vld [vmem:[%s343_s28 + $0x8] sm:$0xff]  ;;  %s624_s27 = sshll.u32 %s400_s24, 4  ;;  %s626_s13 = sshll.u32 %s623_s25, 4  ;;  %s625_s27 = int_to_ptr.vmem [resolvable:$true] %s624_s27  ;;  %s627_s13 = int_to_ptr.hbm [resolvable:$true] %s626_s13 }
  0x43   : > { %843 = vmatmul.msk.f32.vlgmr.msra.gmra.mxu2 %vm411_vm0, %v496_v3  ;;  %838 = vmatmul.msk.f32.vlgmr.msra.gmra.mxu0 %vm411_vm0, %v409_v5  ;;  %v528_v9 = vsel %vm527_vm1, 16843009, %v1206_v8  ;;  %vm439_vm2 = vnez %v438_v7  ;;  %v470_v30 = vld [vmem:[%s343_s28] sm:$0xff]  ;;  %s596_s1 = scalar_lea.sflag [#allocation12], %s1358_s18  ;;  %s1092_s20 = sshra.s32 %s627_s13, 4  ;;  %s1093_s20 = int_to_ptr.hbm [resolvable:$true] %s1092_s20 }
  0x44   : > { %v529_v10 = vunpack.c.0.s8 %v528_v9  ;;  %v440_v11 = vsel %vm439_vm2, 16843009, %v1206_v8  ;;  %578 = vmatpush.msra.mxu3 %v846_v29  ;;  %489 = vmatpush.msra.mxu1 %v470_v30  ;;  %s1094_s7 = scalar_lea.hbm %s1093_s20, 16  ;;  %s1098_s10 = scalar_lea.hbm %s1459_s5, 32 }
  0x45   : > { %v441_v12 = vunpack.c.0.s8 %v440_v11  ;;  %p1095_p4 = scmp.ne.s32.totalorder %s1093_s20, %s1094_s7  ;;  %p1099_p7 = scmp.lt.s32.totalorder %s1093_s20, %s1459_s5 }
  0x46   : > { %vm530_vm3 = vcmp.ne.s32.totalorder %v529_v10, 0  ;;  %p1100_p8 = scmp.lt.s32.totalorder %s1098_s10, %s1094_s7 }
  0x47   : > { %vm442_vm5 = vcmp.ne.s32.totalorder %v441_v12, 0  ;;  %p1096_p5 = pnand %p1095_p4, %p1295_p9 }
  0x48   : > { %p1101_p10 = por %p1100_p8, %p1099_p7 }
  0x49   : > { %p1097_p6 = pneg %p1096_p5 }
  0x4b   : > { %p1102_p13 = pnand %p1101_p10, %p1097_p6 }
  0xc0   : > { %v435_v16 = vpop.f32.mrf.mxu0 }
  0xc1   : > { %v443_v17 = vsel %vm442_vm5, -1e+09, %v435_v16 }
  0xc2   : > { %v445_v18 = vsel %vm444_vm4, %v443_v17, -inf }
  0xc6   : > { %v522_v13 = vpop.f32.mrf.mxu2 }
  0xc7   : > { %v531_v14 = vsel %vm530_vm3, -1e+09, %v522_v13 }
  0xc8   : > { %v532_v15 = vsel %vm444_vm4, %v531_v14, -inf }
  0xc9   : > { %533 = vmax.xlane.f32.xlu0 %v532_v15 }
  0xd1   : > { %446 = vmax.xlane.f32.xlu0 %v445_v18 }
 0x13c   : > { %v534_v19 = vpop.xlane.xlu0 %533 }
 0x13d   : > { %v535_v20 = vsub.f32 %v531_v14, %v534_v19 }
 0x13f   : > { %v536_v21 = vmul.f32 1.442695, %v535_v20 }
 0x141   : > { %950 = vpow2.f32 %v536_v21 }
 0x144   : > { %v447_v22 = vpop.xlane.xlu0 %446 }
 0x145   : > { %v448_v23 = vsub.f32 %v443_v17, %v447_v22 }
 0x147   : > { %v951_v24 = vpop.eup %950  ;;  %v449_v25 = vmul.f32 1.442695, %v448_v23 }
 0x148   : > { %v538_v26 = vsel %vm444_vm4, %v951_v24, 0.0 }
 0x149   : > { %952 = vpow2.f32 %v449_v25  ;;  %539 = vadd.xlane.f32.xlu1 %v538_v26 }
 0x14f   : > { %v953_v27 = vpop.eup %952 }
 0x150   : > { %v451_v28 = vsel %vm444_vm4, %v953_v27, 0.0 }
 0x151   : > { %452 = vadd.xlane.f32.xlu1 %v451_v28 }
 0x1bc   : > { %v540_v31 = vpop.xlane.xlu1 %539 }
 0x1bd   : > { %954 = vrcp.f32 %v540_v31  ;;  %v552_v36 = vand.u32 2147483648, %v540_v31  ;;  %v550_v38 = vand.u32 2147483647, %v540_v31  ;;  %vm546_vm7 = vweird.f32 %v540_v31 }
 0x1bf   : > { %v553_v41 = vor.u32 1.1754944e-38, %v552_v36  ;;  %vm551_vm9 = vcmp.eq.f32.partialorder %v550_v38, 8.507059e+37 }
 0x1c3   : > { %v955_v32 = vpop.eup %954 }
 0x1c4   : > { %v542_v33 = vmul.f32 %v955_v32, %v540_v31  ;;  %v453_v34 = vpop.xlane.xlu1 %452  ;;  %vm547_vm6 = vweird.f32 %v955_v32 }
 0x1c5   : > { %956 = vrcp.f32 %v453_v34  ;;  %vm548_vm8 = vmor %vm546_vm7, %vm547_vm6  ;;  %v465_v47 = vand.u32 2147483648, %v453_v34  ;;  %v463_v49 = vand.u32 2147483647, %v453_v34  ;;  %vm459_vm11 = vweird.f32 %v453_v34 }
 0x1c6   : > { %v543_v35 = vsub.f32 1.0, %v542_v33 }
 0x1c7   : > { %v466_v51 = vor.u32 1.1754944e-38, %v465_v47  ;;  %vm464_vm13 = vcmp.eq.f32.partialorder %v463_v49, 8.507059e+37 }
 0x1c8   : > { %v544_v37 = vmul.f32 %v955_v32, %v543_v35 }
 0x1ca   : > { %v545_v39 = vadd.f32 %v955_v32, %v544_v37 }
 0x1cb   : > { %v957_v40 = vpop.eup %956 }
 0x1cc   : > { %v455_v42 = vmul.f32 %v957_v40, %v453_v34  ;;  %v549_v43 = vsel %vm548_vm8, %v955_v32, %v545_v39  ;;  %vm460_vm10 = vweird.f32 %v957_v40 }
 0x1cd   : > { %v554_v44 = vsel %vm551_vm9, %v553_v41, %v549_v43  ;;  %vm461_vm12 = vmor %vm459_vm11, %vm460_vm10 }
 0x1ce   : > { %v456_v45 = vsub.f32 1.0, %v455_v42  ;;  %v555_v46 = vmul.f32 %v951_v24, %v554_v44 }
 0x1d0   : > { %v457_v48 = vmul.f32 %v957_v40, %v456_v45  ;;  %845 = vst.msk [vmem:[%s400_s24 + $0x8] sm:$0xff] %vm444_vm4, %v555_v46  ;;  %847 = vmatmul.msk.f32.vlgmr.msra.gmra.mxu3 %vm444_vm4, %v555_v46 }
 0x1d2   : > { %v458_v50 = vadd.f32 %v957_v40, %v457_v48 }
 0x1d4   : > { %v462_v52 = vsel %vm461_vm12, %v957_v40, %v458_v50 }
 0x1d5   : > { %v467_v53 = vsel %vm464_vm13, %v466_v51, %v462_v52 }
 0x1d6   : > { %v468_v54 = vmul.f32 %v953_v27, %v467_v53 }
 0x1d8   : > { %469 = vst.msk [vmem:[%s400_s24] sm:$0xff] %vm444_vm4, %v468_v54  ;;  %839 = vmatmul.msk.f32.vlgmr.msra.gmra.mxu1 %vm444_vm4, %v468_v54 }
 0x1d9   : > { %1105 = shalt.err (!%p1102_p13)
}
 0x1da   : > { %s1207_s26 = smov 128   ;;  %s1208_s8 = smov 8   ;;  %vm588_vm14 = vcmask 523264  }
 0x1db   : > { %869 = dma.vmem_to_hbm [thread:$0]  (%p1295_p9), %s625_s27, 256, %s627_s13, %s596_s1, %s1207_s26, %s1207_s26, %s1208_s8  }
 0x1dc   : > { %s1209_s9 = smov 32   ;;  %s835_s12 = sshll.u32 %s1358_s18, 3 }
 0x1dd   : > { %s850_s29 = sshll.u32 %s1192_s21, 3  ;;  %s1484_s17 = sld [smem:[#allocation26_spill]] }
 0x1de   : > { %s393_s30 = scalar_lea.vmem [#allocation10], %s835_s12  ;;  %s591_s27 = scalar_lea.sflag [#allocation4], %s1358_s18 }
 0x1df   : > { %s609_s15 = sshll.u32 %s393_s30, 4  ;;  %s610_s15 = int_to_ptr.vmem [resolvable:$true] %s609_s15 }
 0x1e3   : > { %s607_s24 = scalar_lea.hbm %s1484_s17, %s850_s29  ;;  %s1126_s20 = scalar_lea.hbm %s1484_s17, 16 }
 0x1e4   : > { %s611_s16 = sshll.u32 %s607_s24, 4  ;;  %s612_s16 = int_to_ptr.hbm [resolvable:$true] %s611_s16 }
 0x1e5   : > { %s1120_s25 = sshra.s32 %s612_s16, 4  ;;  %s1121_s25 = int_to_ptr.hbm [resolvable:$true] %s1120_s25 }
 0x1e6   : > { %s1122_s21 = scalar_lea.hbm %s1121_s25, 8  ;;  %p1127_p3 = scmp.lt.s32.totalorder %s1121_s25, %s1484_s17 }
 0x1e7   : > { %p1123_p0 = scmp.ne.s32.totalorder %s1121_s25, %s1122_s21  ;;  %p1128_p4 = scmp.lt.s32.totalorder %s1126_s20, %s1122_s21 }
 0x1e9   : > { %p1124_p1 = pnand %p1123_p0, %p1295_p9  ;;  %p1129_p5 = por %p1128_p4, %p1127_p3 }
 0x1eb   : > { %p1125_p2 = pneg %p1124_p1 }
 0x1ed   : > { %p1130_p6 = pnand %p1129_p5, %p1125_p2 }
 0x253   : > { %v580_v55 = vpop.f32.mrf.mxu3 }
 0x254   : > { %584 = vrot.lane.b32.xlu2 %v580_v55, %s1209_s9 }
 0x255   : > { %v491_v56 = vpop.f32.mrf.mxu1 }
 0x2ae   : > { %v585_v57 = vpop.permute.xlu2 %584 }
 0x2af   : > { %v587_v58 = vsel %vm411_vm0, %v491_v56, %v585_v57 }
 0x2b0   : > { %589 = vst.msk [vmem:[%s393_s30] sm:$0xff] %vm588_vm14, %v587_v58 }
 0x2b1   : > { %1133 = shalt.err (!%p1130_p6)
}
 0x2b2   : > { %868 = dma.vmem_to_hbm [thread:$0]  (%p1295_p9), %s610_s15, 128, %s612_s16, %s591_s27  }
 0x2b3 PF: > { %s1485_s18 = sld [smem:[#allocation18_spill]]  ;;  %p886_p7 = pnand %p817_p12, %p1302_p11 }
 0x2b4   : > { %s1487_s10 = sld [smem:[#allocation20_spill]] }
 0x2b5   : > { %p887_p8 = pneg %p886_p7 }
 0x2b9   : > { %s641_s0 = sand.u32 1, %s1485_s18  }
 0x2ba   : > { %s642_s4 = scalar_lea.sflag [#allocation4], %s641_s0 }
 0x2bb   : > { %1171 = dma.done.wait (%p887_p8), %s642_s4, 128  }
 0x2bc   : > { %1173 = vsyncadd (%p887_p8), %s642_s4, 4294967168  ;;  %s652_s26 = scalar_lea.sflag [#allocation12], %s641_s0 }
 0x2bd   : > { %1175 = dma.done.wait (%p887_p8), %s652_s26, 256  }
 0x2be   : > { %1177 = vsyncadd (%p887_p8), %s652_s26, 4294967040  ;;  %s31_s23 = sadd.s32 1, %s1487_s10   ;;  %s1488_s6 = sld [smem:[#allocation19_spill]] }
 0x2bf   : > { %p28_p10 = scmp.ge.s32.totalorder %s31_s23, 4   ;;  %s1489_s20 = sld [smem:[#allocation22_spill]] }
 0x2c0   : > { %s1490_s8 = sld [smem:[#allocation21_spill]]  ;;  %s1491_s18 = smov %s1184_s19 }
 0x2c1   : > { %s1493_s21 = smov %s1196_s22 }
 0x2c2   :  { %30 = sbr.rel (!%p28_p10) target bundleno = 16 (0x10), region = 140 }
 0x2c4   : > { %s1492_s19 = smov %s1488_s6 }
 0x2c6   : > { %s1494_s22 = smov %s1490_s8 }
 0x2c7   :  { %658 = vsyncpa [#allocation3], 1 }
 0x2c8   :  { %660 = vsyncpa [#allocation3 + $0x1], 1 }
 0x2c9   :  { %661 = vsyncpa [#allocation6], 1 }
 0x2ca   :  { %663 = vsyncpa [#allocation6 + $0x1], 1 }
 0x2cb   :  { %664 = vsyncpa [#allocation9], 1 }
 0x2cc   :  { %666 = vsyncpa [#allocation9 + $0x1], 1 }
 0x2cd   :  { %667 = vsyncpa [#allocation4], 1 }
 0x2ce   :  { %669 = vsyncpa [#allocation4 + $0x1], 1 }
 0x2cf   :  { %670 = vsyncpa [#allocation12], 1 }
 0x2d0   :  { %672 = vsyncpa [#allocation12 + $0x1], 1 }

</bundles_post_ra>
